<compile_context>
chip_gen: v7x
topology: tpu7x:2x2x1
jax: 0.10.0
libtpu: 0.0.40
codegen_flags: <defaults>
</compile_context>

<pallas_src>
import jax
import jax.numpy as jnp
from jax.experimental import pallas as pl
from jax.experimental.pallas import tpu as pltpu


# ----------------------------------------------------------------------------
# 1) Structural-parity kernel: scalar identity copy on the SMEM sld/sst path.
#    (Near a hardware no-op; kept only because a pallas_call is mandated.)
# ----------------------------------------------------------------------------
def _identity_kernel(light_ref, out_ref):
    # Pure scalar path: SMEM load -> SMEM store. No vector units, no DMA tiles.
    out_ref[0] = light_ref[0]


_identity_pallas = pl.pallas_call(
    _identity_kernel,
    out_shape=jax.ShapeDtypeStruct((1,), jnp.float32),
    in_specs=[pl.BlockSpec(memory_space=pltpu.MemorySpace.SMEM)],
    out_specs=pl.BlockSpec(memory_space=pltpu.MemorySpace.SMEM),
    # NOTE: no input_output_aliases — the previous alias without donation just
    # forced XLA into a defensive copy; a fresh 4-byte output is cheaper and
    # keeps self.light safely reusable.
)


@jax.jit
def point_light_forward_pallas(light_param: jax.Array) -> jax.Array:
    """Pallas (structural-parity) forward: returns the scalar parameter."""
    return _identity_pallas(light_param).reshape(())


# ----------------------------------------------------------------------------
# 2) Recommended production forward: metadata-only, zero device work.
# ----------------------------------------------------------------------------
def point_light_forward(light_param: jax.Array) -> jax.Array:
    """PointLightNetwork.forward(): return the `light` parameter as a 0-d f32."""
    return light_param.reshape(())


# ----------------------------------------------------------------------------
# 3) Recommended integration pattern: fold the scalar into the *consumer*
#    kernel via an SMEM in_spec (one launch total, scalar rides the sld path).
# ----------------------------------------------------------------------------
def _scale_kernel(light_ref, x_ref, o_ref):
    # light_ref lives in SMEM; the broadcast multiply runs on the VPU over the
    # VMEM-resident tile.
    o_ref[...] = x_ref[...] * light_ref[0]


@jax.jit
def scale_by_light(light_param: jax.Array, x: jax.Array) -> jax.Array:
    """Example downstream consumer: y = light * x, scalar passed through SMEM."""
    return pl.pallas_call(
        _scale_kernel,
        out_shape=jax.ShapeDtypeStruct(x.shape, x.dtype),
        in_specs=[
            pl.BlockSpec(memory_space=pltpu.MemorySpace.SMEM),  # light: f32[1]
            pl.BlockSpec(memory_space=pltpu.MemorySpace.VMEM),  # x: whole array
        ],
        out_specs=pl.BlockSpec(memory_space=pltpu.MemorySpace.VMEM),
    )(light_param, x)


# ----------------------------------------------------------------------------
# Module mirror
# ----------------------------------------------------------------------------
class PointLightNetwork:
    """JAX mirror of the PyTorch module (parameter container + forward)."""

    def __init__(self):
        # nn.Parameter(torch.tensor(5.0)); stored as 1-D f32[1] so the SMEM
        # footprint is 4 bytes if it ever enters a kernel.
        self.light = jnp.full((1,), 5.0, dtype=jnp.float32)

    def forward(self) -> jax.Array:
        # Production path: metadata-only (no kernel launch).
        return point_light_forward(self.light)

    def forward_pallas(self) -> jax.Array:
        # Structural-parity Pallas path (identity SMEM copy).
        return point_light_forward_pallas(self.light)

    def set_light(self, light: float):
        # Setter: rebuilds the device array (host->device). Not a per-step op.
        self.light = jnp.full((1,), float(light), dtype=jnp.float32)

    def get_light(self) -> jax.Array:
        return self.light.reshape(())


if __name__ == "__main__":
    key = jax.random.PRNGKey(0)
    k_light, k_x = jax.random.split(key)

    net = PointLightNetwork()

    # Default parameter value (5.0), as in __init__.
    out_default = jax.block_until_ready(net.forward())
    assert out_default.shape == ()
    assert out_default.dtype == jnp.float32
    assert float(out_default) == 5.0

    # Structural-parity Pallas kernel agrees with the metadata path.
    out_pallas = jax.block_until_ready(net.forward_pallas())
    assert out_pallas.shape == ()
    assert float(out_pallas) == 5.0

    # set_light + forward round-trip with a deterministic value.
    new_light = float(jax.random.uniform(k_light, (), minval=0.0, maxval=10.0))
    net.set_light(new_light)
    out_set = jax.block_until_ready(net.forward())
    assert abs(float(out_set) - new_light) < 1e-6
    out_set_pallas = jax.block_until_ready(net.forward_pallas())
    assert abs(float(out_set_pallas) - new_light) < 1e-6
    assert abs(float(net.get_light()) - new_light) < 1e-6

    # Recommended consumer-fusion path: scalar via SMEM into a downstream kernel.
    x = jax.random.normal(k_x, (8, 128), dtype=jnp.float32)
    y = jax.block_until_ready(scale_by_light(net.light, x))
    y_ref = x * new_light
    assert jnp.allclose(y, y_ref, rtol=1e-6, atol=1e-6)

    print("KERNEL_OK")
</pallas_src>

<mosaic_0001>
module attributes {stable_mosaic.version = 11 : i64} {
  func.func @_identity_kernel(%arg0: memref<1xf32, #tpu.memory_space<smem>>, %arg1: memref<1xf32, #tpu.memory_space<smem>>) attributes {dimension_semantics = [], scalar_prefetch = 0 : i64, scratch_operands = 0 : i64, tpu.core_type = #tpu.core_type<tc>} {
    %c0 = arith.constant 0 : index
    %0 = memref.load %arg0[%c0] : memref<1xf32, #tpu.memory_space<smem>>
    %c0_0 = arith.constant 0 : index
    %1 = memref.load %arg1[%c0_0] : memref<1xf32, #tpu.memory_space<smem>>
    memref.store %0, %arg1[%c0_0] : memref<1xf32, #tpu.memory_space<smem>>
    return
  }
}

</mosaic_0001>

<bundles_post_ra>
// kernel: point_light_forward_pallas.1
= control target key start
LH: loop header
LB: loop body
LE: loop exit
PB: predicated region body
PF: predicated region fallthrough
CT: control target
= control target key end

     0   :  { %7 = vsyncpa [#allocation4], 0  ;;  %s65_s0 = inlined_call_operand.<no memory space> [shape: f32[1], index: 0, kind: input, shape index: {}]   ;;  %s66_s1 = inlined_call_operand.hbm [shape: f32[1], index: 1, kind: output, shape index: {}]  }
   0x1   :  { %12 = sst [smem:[#allocation3]] %s65_s0  ;;  %s27_s10 = scalar_lea.hbm %s66_s1, 16 }
   0x2   :  { %p28_p0 = scmp.ne.s32.totalorder %s66_s1, %s27_s10  ;;  %p31_p1 = scmp.lt.u32.totalorder %s27_s10, %s66_s1 }
   0x4   :  { %p33_p2 = pnand %p31_p1, %p28_p0 }
   0x6   :  { %36 = shalt.err (!%p33_p2)
}
   0x7   :  { %s39_s15 = smov [#allocation3]  }
   0x8   :  { %20 = dma.smem_to_hbm %s39_s15, 16, %s66_s1, [#allocation4]  }
   0x9   :  { %37 = dma.done.wait [#allocation4], 16  }
   0xa   :  { %38 = vsyncadd [#allocation4], 4294967280 }
   0xb   :  { %24 = sfence }
   0xc   :  { %25 = vsyncpa [#allocation4], 1 }

</bundles_post_ra>
